<compile_context>
chip_gen: v6e
topology: v6e:2x2x1
jax: 0.10.0
libtpu: 0.0.40
codegen_flags: <defaults>
</compile_context>

<pallas_src>
import functools

import jax
import jax.numpy as jnp
from jax.experimental import pallas as pl
from jax.experimental.pallas import tpu as pltpu


def linmod_kernel(x_ref, w_enc_ref, b_enc_ref, w_out_ref, b_out_ref, out_ref):
    f32 = jnp.float32
    # Fused encoder: [state || act] @ blockdiag(Ws.T, Wa.T) + [bs || ba], tanh.
    enc = jnp.tanh(
        jnp.dot(x_ref[...], w_enc_ref[...], preferred_element_type=f32)
        + b_enc_ref[...])
    # Fused dynamics+decoders: one matmul produces [next_state | state_dec | act_dec].
    out_ref[...] = (
        jnp.dot(enc, w_out_ref[...], preferred_element_type=f32)
        + b_out_ref[...]).astype(out_ref.dtype)


def prepare_params(p):
    """One-time re-layout/prefold of PyTorch-convention params into fused kernel weights."""
    f32 = jnp.float32
    ws_t = p["Ws"].T.astype(f32)     # [state_dim, state_enc_dim]
    wa_t = p["Wa"].T.astype(f32)     # [act_dim,   act_enc_dim]
    wsd_t = p["Wsd"].T.astype(f32)   # [state_enc_dim, state_dim]
    wad_t = p["Wad"].T.astype(f32)   # [act_enc_dim,   act_dim]
    a_t = p["A"].T.astype(f32)       # [state_enc_dim, state_enc_dim]
    b_t = p["B"].T.astype(f32)       # [act_enc_dim,   state_enc_dim]

    state_dim, state_enc_dim = ws_t.shape
    act_dim, act_enc_dim = wa_t.shape
    in_tot = state_dim + act_dim
    enc_tot = state_enc_dim + act_enc_dim

    # Encoder: blockdiag(Ws.T, Wa.T) : [state_dim+act_dim, state_enc+act_enc]
    w_enc = jnp.zeros((in_tot, enc_tot), f32)
    w_enc = w_enc.at[:state_dim, :state_enc_dim].set(ws_t)
    w_enc = w_enc.at[state_dim:, state_enc_dim:].set(wa_t)
    b_enc = jnp.concatenate([p["bs"], p["ba"]]).astype(f32)[None, :]

    # Dynamics folded into the state decoder:
    #   next_state = (enc @ [A.T ; B.T]) @ Wsd.T + bsd = enc @ ([A.T ; B.T] @ Wsd.T) + bsd
    w_dyn = jnp.concatenate([a_t, b_t], axis=0)            # [enc_tot, state_enc_dim]
    w_next = w_dyn @ wsd_t                                  # [enc_tot, state_dim]

    # Decoders on the raw encodings: blockdiag(Wsd.T, Wad.T)
    w_dec = jnp.zeros((enc_tot, state_dim + act_dim), f32)
    w_dec = w_dec.at[:state_enc_dim, :state_dim].set(wsd_t)
    w_dec = w_dec.at[state_enc_dim:, state_dim:].set(wad_t)

    # Single output matmul: [next_state | state_dec | act_dec]
    w_out = jnp.concatenate([w_next, w_dec], axis=1)        # [enc_tot, 2*sd + ad]
    b_out = jnp.concatenate(
        [p["bsd"], p["bsd"], p["bad"]]).astype(f32)[None, :]

    return {
        "w_enc": w_enc, "b_enc": b_enc,
        "w_out": w_out, "b_out": b_out,
        "state_dim": state_dim, "act_dim": act_dim,
    }


def _choose_tile(batch):
    """Batch tile: multiple of 8 (sublane granularity), grid >= 2 when possible, <= 4096 rows."""
    if batch <= 8:
        return batch                      # single block == full array dim (always legal)
    half = -(-batch // 2)                 # ceil(B/2) -> at least 2 grid steps (v7x megacore)
    tm = -(-half // 8) * 8                # round up to a multiple of 8
    return min(tm, 4096)


@functools.partial(jax.jit, static_argnames=())
def linmod_forward(state, act, prep):
    """Jitted forward: pack inputs, one pallas_call over a batch grid, split output slab."""
    f32 = jnp.float32
    state = state.astype(f32)
    act = act.astype(f32)

    batch = state.shape[0]
    state_dim = state.shape[1]
    act_dim = act.shape[1]
    out_dim = 2 * state_dim + act_dim

    # Pack once in the wrapper (fuses into the same HBM pass; one input DMA stream).
    x = jnp.concatenate([state, act], axis=1)               # [B, state_dim + act_dim]
    in_dim = x.shape[1]

    tm = _choose_tile(batch)
    grid = (pl.cdiv(batch, tm),)

    w_enc, b_enc = prep["w_enc"], prep["b_enc"]
    w_out, b_out = prep["w_out"], prep["b_out"]

    def batch_map(i):
        return (i, 0)

    def const_map(i):
        return (0, 0)

    out = pl.pallas_call(
        linmod_kernel,
        out_shape=jax.ShapeDtypeStruct((batch, out_dim), f32),
        grid_spec=pltpu.PrefetchScalarGridSpec(
            num_scalar_prefetch=0,
            grid=grid,
            in_specs=[
                pl.BlockSpec((tm, in_dim), batch_map),       # packed [state||act]
                pl.BlockSpec(w_enc.shape, const_map),        # fused encoder W (resident)
                pl.BlockSpec(b_enc.shape, const_map),        # fused encoder b
                pl.BlockSpec(w_out.shape, const_map),        # fused dyn+dec W (resident)
                pl.BlockSpec(b_out.shape, const_map),        # fused dyn+dec b
            ],
            out_specs=pl.BlockSpec((tm, out_dim), batch_map),
        ),
        compiler_params=pltpu.CompilerParams(
            dimension_semantics=("parallel",),
            vmem_limit_bytes=32 << 20,
        ),
    )(x, w_enc, b_enc, w_out, b_out)

    # Callers want three arrays; slicing the slab is an accepted extra pass.
    next_state = out[:, :state_dim]
    state_dec = out[:, state_dim:2 * state_dim]
    act_dec = out[:, 2 * state_dim:]
    return next_state, state_dec, act_dec


def make_params(key, state_dim, act_dim, state_enc_dim, act_enc_dim):
    """Deterministic synthetic parameters (PyTorch-convention weight shapes)."""
    ks = jax.random.split(key, 10)
    f = jnp.float32
    return {
        "Ws": 0.3 * jax.random.normal(ks[0], (state_enc_dim, state_dim), f),
        "bs": 0.1 * jax.random.normal(ks[1], (state_enc_dim,), f),
        "Wa": 0.3 * jax.random.normal(ks[2], (act_enc_dim, act_dim), f),
        "ba": 0.1 * jax.random.normal(ks[3], (act_enc_dim,), f),
        "Wsd": 0.3 * jax.random.normal(ks[4], (state_dim, state_enc_dim), f),
        "bsd": 0.1 * jax.random.normal(ks[5], (state_dim,), f),
        "Wad": 0.3 * jax.random.normal(ks[6], (act_dim, act_enc_dim), f),
        "bad": 0.1 * jax.random.normal(ks[7], (act_dim,), f),
        "A": jax.random.normal(ks[8], (state_enc_dim, state_enc_dim), f),
        "B": jax.random.normal(ks[9], (state_enc_dim, act_enc_dim), f),
    }


def linmod_reference(state, act, p):
    """Pure-JAX reference mirroring the PyTorch forward (for verification)."""
    state_enc = jnp.tanh(state @ p["Ws"].T + p["bs"])
    act_enc = jnp.tanh(act @ p["Wa"].T + p["ba"])
    next_enc = (p["A"] @ state_enc.T).T + (p["B"] @ act_enc.T).T
    next_state = next_enc @ p["Wsd"].T + p["bsd"]
    state_dec = state_enc @ p["Wsd"].T + p["bsd"]
    act_dec = act_enc @ p["Wad"].T + p["bad"]
    return next_state, state_dec, act_dec


if __name__ == "__main__":
    # Small shapes consistent with the module's __init__.
    # batch=20 exercises the multi-block path (tm=16, grid=2) with a ragged last block.
    batch = 20
    state_dim, act_dim = 12, 6
    state_enc_dim, act_enc_dim = 16, 8

    key = jax.random.PRNGKey(0)
    k_params, k_state, k_act = jax.random.split(key, 3)
    params = make_params(k_params, state_dim, act_dim, state_enc_dim, act_enc_dim)

    # One-time fused-weight preparation (hoisted out of the per-call path).
    prep = prepare_params(params)

    state = jax.random.normal(k_state, (batch, state_dim), jnp.float32)
    act = jax.random.normal(k_act, (batch, act_dim), jnp.float32)

    out = linmod_forward(state, act, prep)
    out = jax.block_until_ready(out)

    ref = linmod_reference(state, act, params)
    for o, r in zip(out, ref):
        assert o.shape == r.shape and o.dtype == r.dtype
        # Prefolding W_next = [A.T;B.T] @ Wsd.T only reassociates f32 products.
        assert jnp.allclose(o, r, atol=1e-4, rtol=1e-4), (
            f"max abs err {jnp.max(jnp.abs(o - r))}")

    print("KERNEL_OK")
</pallas_src>

<mosaic_0001>
module attributes {stable_mosaic.version = 11 : i64} {
  func.func @linmod_kernel(%arg0: i32, %arg1: memref<16x18xf32, #tpu.memory_space<vmem>>, %arg2: memref<18x24xf32, #tpu.memory_space<vmem>>, %arg3: memref<1x24xf32, #tpu.memory_space<vmem>>, %arg4: memref<24x30xf32, #tpu.memory_space<vmem>>, %arg5: memref<1x30xf32, #tpu.memory_space<vmem>>, %arg6: memref<16x30xf32, #tpu.memory_space<vmem>>) attributes {dimension_semantics = [#tpu.dimension_semantics<parallel>], iteration_bounds = array<i64: 2>, scalar_prefetch = 0 : i64, scratch_operands = 0 : i64, tpu.core_type = #tpu.core_type<tc>, window_params = [{transform_indices = @transform_0, window_bounds = array<i64: 16, 18>}, {pipeline_mode = #tpu.pipeline_mode<synchronous>, transform_indices = @transform_1, window_bounds = array<i64: 18, 24>}, {pipeline_mode = #tpu.pipeline_mode<synchronous>, transform_indices = @transform_2, window_bounds = array<i64: 1, 24>}, {pipeline_mode = #tpu.pipeline_mode<synchronous>, transform_indices = @transform_3, window_bounds = array<i64: 24, 30>}, {pipeline_mode = #tpu.pipeline_mode<synchronous>, transform_indices = @transform_4, window_bounds = array<i64: 1, 30>}, {transform_indices = @transform_5, window_bounds = array<i64: 16, 30>}]} {
    %c0 = arith.constant 0 : index
    %c0_0 = arith.constant 0 : index
    %0 = vector.load %arg1[%c0, %c0_0] : memref<16x18xf32, #tpu.memory_space<vmem>>, vector<16x18xf32>
    %c0_1 = arith.constant 0 : index
    %c0_2 = arith.constant 0 : index
    %1 = vector.load %arg2[%c0_1, %c0_2] : memref<18x24xf32, #tpu.memory_space<vmem>>, vector<18x24xf32>
    %cst = arith.constant dense<0.000000e+00> : vector<16x24xf32>
    %2 = tpu.matmul %0, %1, %cst {dimension_numbers = #tpu.dot_dimension_numbers<[1], [0], [0], [1], [0, 0, 1, 1], [], []>} : vector<16x18xf32>, vector<18x24xf32>, vector<16x24xf32> -> vector<16x24xf32>
    %c0_3 = arith.constant 0 : index
    %c0_4 = arith.constant 0 : index
    %3 = vector.load %arg3[%c0_3, %c0_4] : memref<1x24xf32, #tpu.memory_space<vmem>>, vector<1x24xf32>
    %4 = vector.broadcast %3 : vector<1x24xf32> to vector<16x24xf32>
    %5 = arith.addf %2, %4 : vector<16x24xf32>
    %6 = math.tanh %5 : vector<16x24xf32>
    %c0_5 = arith.constant 0 : index
    %c0_6 = arith.constant 0 : index
    %7 = vector.load %arg4[%c0_5, %c0_6] : memref<24x30xf32, #tpu.memory_space<vmem>>, vector<24x30xf32>
    %cst_7 = arith.constant dense<0.000000e+00> : vector<16x30xf32>
    %8 = tpu.matmul %6, %7, %cst_7 {dimension_numbers = #tpu.dot_dimension_numbers<[1], [0], [0], [1], [0, 0, 1, 1], [], []>} : vector<16x24xf32>, vector<24x30xf32>, vector<16x30xf32> -> vector<16x30xf32>
    %c0_8 = arith.constant 0 : index
    %c0_9 = arith.constant 0 : index
    %9 = vector.load %arg5[%c0_8, %c0_9] : memref<1x30xf32, #tpu.memory_space<vmem>>, vector<1x30xf32>
    %10 = vector.broadcast %9 : vector<1x30xf32> to vector<16x30xf32>
    %11 = arith.addf %8, %10 : vector<16x30xf32>
    %c0_10 = arith.constant 0 : index
    %c0_11 = arith.constant 0 : index
    %12 = vector.load %arg6[%c0_10, %c0_11] : memref<16x30xf32, #tpu.memory_space<vmem>>, vector<16x30xf32>
    tpu.vector_store %arg6[%c0_10, %c0_11], %11 {strides = array<i32>} : memref<16x30xf32, #tpu.memory_space<vmem>>, vector<16x30xf32>,
    return
  }
  func.func @transform_0(%arg0: i32) -> (i32, i32) {
    %c0_i32 = arith.constant 0 : i32
    %c0_i32_0 = arith.constant 0 : i32
    return %arg0, %c0_i32 : i32, i32
  }
  func.func @transform_1(%arg0: i32) -> (i32, i32) {
    %c0_i32 = arith.constant 0 : i32
    %c0_i32_0 = arith.constant 0 : i32
    %c0_i32_1 = arith.constant 0 : i32
    return %c0_i32, %c0_i32_0 : i32, i32
  }
  func.func @transform_2(%arg0: i32) -> (i32, i32) {
    %c0_i32 = arith.constant 0 : i32
    %c0_i32_0 = arith.constant 0 : i32
    %c0_i32_1 = arith.constant 0 : i32
    return %c0_i32, %c0_i32_0 : i32, i32
  }
  func.func @transform_3(%arg0: i32) -> (i32, i32) {
    %c0_i32 = arith.constant 0 : i32
    %c0_i32_0 = arith.constant 0 : i32
    %c0_i32_1 = arith.constant 0 : i32
    return %c0_i32, %c0_i32_0 : i32, i32
  }
  func.func @transform_4(%arg0: i32) -> (i32, i32) {
    %c0_i32 = arith.constant 0 : i32
    %c0_i32_0 = arith.constant 0 : i32
    %c0_i32_1 = arith.constant 0 : i32
    return %c0_i32, %c0_i32_0 : i32, i32
  }
  func.func @transform_5(%arg0: i32) -> (i32, i32) {
    %c0_i32 = arith.constant 0 : i32
    %c0_i32_0 = arith.constant 0 : i32
    return %arg0, %c0_i32 : i32, i32
  }
}

</mosaic_0001>

<bundles_post_ra>
// kernel: linmod_forward.1
= control target key start
LH: loop header
LB: loop body
LE: loop exit
PB: predicated region body
PF: predicated region fallthrough
CT: control target
= control target key end

     0   :  { %s933_s18 = smov 0   ;;  %s935_s19 = smov 0   ;;  %s1040_s0 = inlined_call_operand.vmem [shape: f32[20,18], index: 0, kind: input, shape index: {}]   ;;  %s1041_s1 = inlined_call_operand.vmem [shape: f32[18,24], index: 1, kind: input, shape index: {}]   ;;  %s1042_s2 = inlined_call_operand.vmem [shape: f32[1,24], index: 2, kind: input, shape index: {}]   ;;  %s1043_s3 = inlined_call_operand.vmem [shape: f32[24,30], index: 3, kind: input, shape index: {}]   ;;  %s1044_s4 = inlined_call_operand.vmem [shape: f32[1,30], index: 4, kind: input, shape index: {}]   ;;  %s1045_s5 = inlined_call_operand.vmem [shape: f32[20,30], index: 5, kind: output, shape index: {}]  }
   0x1   :  { %s937_s20 = smov 0  }
   0x2 LB: > { %s946_s21 = sadd.s32 4294967295, %s869_s20   ;;  %s948_s22 = sadd.s32 1, %s869_s20   ;;  %s869_s20 = sphi %s937_s20, %s1049_s20   ;;  %s865_s19 = sphi %s935_s19, %s1048_s19   ;;  %s861_s18 = sphi %s933_s18, %s1047_s18  }
   0x3   : > { %s129_s23 = ssub.s32 %s869_s20, %s948_s22  ;;  %s132_s24 = sadd.s32 1, %s865_s19 }
   0x4   : > { %p130_p0 = scmp.eq.s32.totalorder %s129_s23, 0  ;;  %p142_p1 = scmp.ne.s32.totalorder %s865_s19, %s861_s18 }
   0x5   : > { %p143_p2 = scmp.eq.s32.totalorder %s946_s21, 1  ;;  %p664_p3 = scmp.ge.s32.totalorder %s869_s20, 1 }
   0x6   : > { %s956_s25 = scalar_select %p130_p0, %s865_s19, %s132_s24  }
   0x7   : > { %p958_p4 = por %p143_p2, %p142_p1  ;;  %p196_p5 = scmp.lt.s32.totalorder %s869_s20, 3 }
   0x9   : > { %p197_p6 = pnand %p664_p3, %p196_p5 }
   0xa   : > { %s969_s6 = sshll.u32 (!%p197_p6), %s946_s21, 1  ;;  %s224_s28 = sand.u32 (!%p197_p6), 1, %s861_s18  }
   0xb   : > { %200 = sbr.rel (%p197_p6) target bundleno = 472 (0x1d8), region = 40  ;;  %p232_p7 = scmp.lt.s32.totalorder (!%p197_p6), %s969_s6, 2 }
   0xc   : > { %s665_s29 = sshll.u32 (!%p197_p6), %s224_s28, 4 }
   0xd   : > { %s995_s8 = scalar_lea.vmem (!%p197_p6), [#allocation2], %s665_s29  }
  0x10   : > { %v250_v0 = vld [vmem:[%s1041_s1 + $0x10] sm:$0x3]  ;;  %vm265_vm0 = vcmask 1041408   ;;  %v249_v1 = vld [vmem:[%s1041_s1 + $0x8] sm:$0xff]  ;;  %v248_v2 = vld [vmem:[%s1041_s1] sm:$0xff]  ;;  %s233_s9 = scalar_select %p232_p7, %s969_s6, 2 }
  0x11   : > { %705 = vmatprep.subr.msk.mxu0 %vm265_vm0, %v250_v0  ;;  %vm258_vm1 = vcmask 146432   ;;  %v348_v5 = vld [vmem:[%s1043_s3 + $0x10] sm:$0xff]  ;;  %v347_v6 = vld [vmem:[%s1043_s3 + $0x8] sm:$0xff]  ;;  %v346_v7 = vld [vmem:[%s1043_s3] sm:$0xff]  ;;  %vm356_vm2 = vcmask 195584   ;;  %vm438_vm3 = vcmask 244736  }
  0x12   : > { %706 = vmatpush3.msk.msra.mxu0 %vm265_vm0, %v250_v0  ;;  %s667_s10 = sshll.u32 %s233_s9, 3  ;;  %714 = vmatprep.subr.mxu1 %v348_v5  ;;  %v668_v8 = vld [vmem:[%s1042_s2] ss:$0 sm:$0xff]  ;;  %s449_s18 = ssub.s32 (%p958_p4), 3, %s969_s6 }
  0x13   : > { %707 = vmatprep.subr.mxu0 %v249_v1  ;;  %s235_s13 = scalar_lea.vmem %s1040_s0, %s667_s10  ;;  %715 = vmatpush3.msra.mxu1 %v348_v5  ;;  %v672_v15 = vld [vmem:[%s1044_s4] ss:$0 sm:$0xff]  ;;  %s692_s9 = sshll.u32 (%p958_p4), %s946_s21, 4 }
  0x14   : > { %708 = vmatpush3.msra.mxu0 %v249_v1  ;;  %v246_v3 = vld [vmem:[%s235_s13] sm:$0xff]  ;;  %v247_v4 = vld [vmem:[%s235_s13 + $0x8] sm:$0xff]  ;;  %716 = vmatprep.subr.mxu1 %v347_v6  ;;  %p450_p8 = scmp.lt.s32.totalorder (%p958_p4), %s449_s18, 2  ;;  %s1006_s12 = scalar_lea.vmem (%p958_p4), %s1045_s5, %s692_s9  }
  0x15   : > { %709 = vmatprep.subr.mxu0 %v248_v2  ;;  %711 = vmatprep.mubr.msk.f32.mxu0 %vm258_vm1, %v246_v3 }
  0x16   : > { %710 = vmatpush3.msra.mxu0 %v248_v2  ;;  %717 = vmatpush3.msra.mxu1 %v347_v6 }
  0x17   : > { %712 = vmatmul.mubr.msk.f32.vlgmr.msra.gmra.mxu0 %vm258_vm1, %v247_v4  ;;  %718 = vmatprep.subr.mxu1 %v346_v7 }
  0x18   : > { %719 = vmatpush3.msra.mxu1 %v346_v7 }
  0xd7   : > { %v713_v9 = vpop.f32.mrf.mxu0 }
  0xd8   : > { %v341_v10 = vadd.f32 %v713_v9, %v668_v8 }
  0xd9   : > { %v335_v11 = vpop.f32.mrf.mxu0 }
  0xda   : > { %v336_v12 = vadd.f32 %v668_v8, %v335_v11 }
  0xdc   : > { %811 = vtanh.f32 %v336_v12 }
  0xdd   : > { %813 = vtanh.f32 %v341_v10 }
  0xe9   : > { %v812_v13 = vpop.eup %811 }
  0xea   : > { %v814_v14 = vpop.eup %813  ;;  %720 = vmatprep.mubr.msk.f32.mxu1 %vm356_vm2, %v812_v13 }
  0xeb   : > { %721 = vmatmul.mubr.msk.f32.vlgmr.msra.gmra.mxu1 %vm356_vm2, %v814_v14 }
 0x1ab   : > { %v722_v16 = vpop.f32.mrf.mxu1 }
 0x1ac   : > { %v435_v17 = vadd.f32 %v722_v16, %v672_v15  ;;  %447 = sbr.rel (!%p958_p4) target bundleno = 472 (0x1d8), region = 44 }
 0x1ad   : > { %v429_v18 = vpop.f32.mrf.mxu1 }
 0x1ae   : > { %440 = vst.msk [vmem:[%s995_s8 + $0x8] sm:$0xff] %vm438_vm3, %v435_v17  ;;  %v430_v19 = vadd.f32 %v672_v15, %v429_v18 }
 0x1b0   : > { %439 = vst.msk [vmem:[%s995_s8] sm:$0xff] %vm438_vm3, %v430_v19 }
 0x1b1   : > { %s1051_s18 = smov (!%p450_p8, %s449_s18), 2 }
 0x1b2   : > { %s677_s13 = sshll.u32 %s1051_s18, 7 }
 0x1b3   : > { %p680_p9 = scmp.eq.s32.totalorder %s677_s13, 0 }
 0x1b4   : > { %s1012_s14 = sshrl.u32 (!%p680_p9), %s1051_s18, 1 }
 0x1b5   : > { %458 = sbr.rel (%p680_p9) target bundleno = 472 (0x1d8), region = 48  ;;  %p681_p10 = scmp.le.s32.totalorder (!%p680_p9), %s1012_s14, 0 }
 0x1ba   : > { %617 = sbr.rel (%p681_p10) target bundleno = 455 (0x1c7), region = 124  ;;  %s871_s21 = smov (!%p681_p10), %s1006_s12  }
 0x1bb   : > { %s875_s26 = smov (!%p681_p10), %s995_s8   ;;  %s879_s6 = smov (!%p681_p10), 0  }
 0x1bc   : > { %s883_s15 = smov (!%p681_p10), 0  }
 0x1bf LB: >> { %v523_v20 = vld [vmem:[%s877_s26] sm:$0xff]  ;;  %v525_v21 = vld [vmem:[%s877_s26 + $0x8] sm:$0xff]  ;;  %s527_s16 = sadd.s32 1, %s881_s6  ;;  %s517_s15 = sadd.s32 1, %s885_s15   ;;  %s885_s15 = sphi %s883_s15, %s517_s15   ;;  %s881_s6 = sphi %s879_s6, %s880_s6   ;;  %s877_s26 = sphi %s875_s26, %s532_s26   ;;  %s873_s21 = sphi %s871_s21, %s533_s21  }
 0x1c0   : >> { %524 = vst [vmem:[%s873_s21] sm:$0xff] %v523_v20  ;;  %526 = vst [vmem:[%s873_s21 + $0x8] sm:$0xff] %v525_v21  ;;  %p528_p11 = scmp.ge.s32.totalorder %s527_s16, %s1012_s14  ;;  %p516_p12 = scmp.ge.s32.totalorder %s517_s15, %s1012_s14 }
 0x1c2   : >> { %s1053_s16 = smov (%p528_p11, %s527_s16), 0  ;;  %519 = sbr.rel (!%p516_p12) target bundleno = 447 (0x1bf), region = 130 }
 0x1c3   : >> { %s682_s17 = sshll.u32 %s1053_s16, 4  ;;  %s880_s6 = smov %s1053_s16  }
 0x1c4   : >> { %s532_s26 = scalar_lea.vmem %s995_s8, %s682_s17 [#allocation2]   ;;  %s533_s21 = scalar_lea.vmem %s1006_s12, %s682_s17  }
 0x1c7 PF: > { %s1022_s20 = sand.u32 1, %s1051_s18   ;;  %s693_s23 = sshll.u32 %s1012_s14, 4 }
 0x1c8   : > { %s538_s24 = scalar_lea.vmem %s995_s8, %s693_s23 [#allocation2]   ;;  %s540_s27 = scalar_lea.vmem %s1006_s12, %s693_s23  }
 0x1c9   : > { %p687_p13 = scmp.le.s32.totalorder %s1022_s20, 0 }
 0x1ca   : > { %s887_s28 = smov (!%p687_p13), %s540_s27   ;;  %s891_s29 = smov (!%p687_p13), %s538_s24  }
 0x1cb   : > { %631 = sbr.rel (%p687_p13) target bundleno = 472 (0x1d8), region = 135  ;;  %s895_s30 = smov (!%p687_p13), 0  }
 0x1cc   : > { %s899_s7 = smov (!%p687_p13), 0  }
 0x1d0 LB: >> { %v550_v22 = vld [vmem:[%s893_s29] sm:$0xff]  ;;  %s552_s18 = sadd.s32 1, %s897_s30  ;;  %s544_s7 = sadd.s32 1, %s901_s7   ;;  %s901_s7 = sphi %s899_s7, %s544_s7   ;;  %s897_s30 = sphi %s895_s30, %s896_s30   ;;  %s893_s29 = sphi %s891_s29, %s557_s29   ;;  %s889_s28 = sphi %s887_s28, %s558_s28  }
 0x1d1   : >> { %551 = vst [vmem:[%s889_s28] sm:$0xff] %v550_v22  ;;  %p553_p0 = scmp.ge.s32.totalorder %s552_s18, %s1022_s20  ;;  %p543_p1 = scmp.ge.s32.totalorder %s544_s7, %s1022_s20 }
 0x1d3   : >> { %s1055_s18 = smov (%p553_p0, %s552_s18), 0  ;;  %546 = sbr.rel (!%p543_p1) target bundleno = 464 (0x1d0), region = 141 }
 0x1d4   : >> { %s688_s8 = sshll.u32 %s1055_s18, 3  ;;  %s896_s30 = smov %s1055_s18  }
 0x1d5   : >> { %s557_s29 = scalar_lea.vmem %s538_s24, %s688_s8 [#allocation2]   ;;  %s558_s28 = scalar_lea.vmem %s540_s27, %s688_s8  }
 0x1d8 PF: > { %p12_p2 = scmp.ge.s32.totalorder %s948_s22, 4   ;;  %s1047_s18 = smov %s865_s19 }
 0x1d9   : > { %s1048_s19 = smov %s956_s25  ;;  %s1049_s20 = smov %s948_s22 }
 0x1da   :  { %14 = sbr.rel (!%p12_p2) target bundleno = 2 (0x2), region = 152 }

</bundles_post_ra>
